<compile_context>
chip_gen: v5e
topology: v5e:2x2
jax: 0.10.0
libtpu: 0.0.40
codegen_flags: <defaults>
</compile_context>

<pallas_src>
import functools

import jax
import jax.numpy as jnp
from jax import lax
from jax.experimental import pallas as pl
from jax.experimental.pallas import tpu as pltpu  # noqa: F401  (not needed at this size)


# ---------------- small config (shapes consistent with the module) ----------------
class Config:
    hidden_size = 128          # D: full 128-lane multiple (lane-dense output)
    num_channels = 3
    image_size = 32
    patch_size = 8             # -> num_patches = (32/8)^2 = 16


# ---------------- Pallas kernel ----------------------------------------------------
def patch_embed_kernel(patch_ref, w_ref, pos_ref, out_ref, *, batch):
    """Single grid step over the whole (flattened) batch.

    patch_ref: (B*N, K) f32  unfolded patches, all images (K = C*P*P)
    w_ref:     (K, D)   f32  conv weight, flattened + transposed (resident)
    pos_ref:   (N, D)   f32  positional table with conv bias pre-folded in
    out_ref:   (B*N, D) f32
    """
    acc = jnp.dot(patch_ref[...], w_ref[...], preferred_element_type=jnp.float32)
    # Broadcast the (N, D) pos+bias table over the batch (row order is b*N + n).
    out_ref[...] = acc + jnp.tile(pos_ref[...], (batch, 1))


# ---------------- host-side glue ----------------------------------------------------
def extract_patches(pixel_values, patch_size):
    """NCHW -> (B, num_patches, C*P*P); patch order row-major over (H/P, W/P),
    matching Conv2d(stride=P).flatten(2).transpose(1, 2)."""
    B, C, H, W = pixel_values.shape
    P = patch_size
    x = pixel_values.reshape(B, C, H // P, P, W // P, P)
    x = x.transpose(0, 2, 4, 1, 3, 5)                 # (B, H/P, W/P, C, P, P)
    return x.reshape(B, (H // P) * (W // P), C * P * P)


def prepare_params(raw, cfg):
    """One-time (init-time) param prep: weight transpose + bias folded into pos."""
    D = cfg.hidden_size
    K = cfg.num_channels * cfg.patch_size * cfg.patch_size
    w2d = raw["conv_w"].reshape(D, K).T.astype(jnp.float32)            # (K, D)
    pos_plus_bias = (raw["pos_emb"] + raw["conv_b"][None, :]).astype(jnp.float32)
    return {"w2d": w2d, "pos_plus_bias": pos_plus_bias}


@functools.partial(jax.jit, static_argnames=("cfg",))
def siglip_vision_embeddings(pixel_values, prepared, cfg):
    P, D = cfg.patch_size, cfg.hidden_size

    # Unfold the conv into patches (layout-only; fuses into one HBM pass under jit).
    patches = extract_patches(pixel_values, P)          # (B, N, K) f32
    B, N, K = patches.shape
    patches_flat = patches.reshape(B * N, K)            # free view reshape

    kernel = functools.partial(patch_embed_kernel, batch=B)
    out = pl.pallas_call(
        kernel,
        out_shape=jax.ShapeDtypeStruct((B * N, D), jnp.float32),
        grid=(1,),                                       # single fused step
        in_specs=[
            pl.BlockSpec((B * N, K), lambda i: (0, 0)),  # all patches (full block)
            pl.BlockSpec((K, D), lambda i: (0, 0)),      # weight (resident)
            pl.BlockSpec((N, D), lambda i: (0, 0)),      # pos+bias (resident)
        ],
        out_specs=pl.BlockSpec((B * N, D), lambda i: (0, 0)),
    )(patches_flat, prepared["w2d"], prepared["pos_plus_bias"])

    return out.reshape(B, N, D)


# ---------------- parameters --------------------------------------------------------
def init_params(cfg, key):
    D = cfg.hidden_size
    C, P = cfg.num_channels, cfg.patch_size
    N = (cfg.image_size // cfg.patch_size) ** 2
    k1, k2, k3 = jax.random.split(key, 3)
    return {
        "conv_w": (0.02 * jax.random.normal(k1, (D, C, P, P))).astype(jnp.float32),
        "conv_b": (0.02 * jax.random.normal(k2, (D,))).astype(jnp.float32),
        "pos_emb": (0.02 * jax.random.normal(k3, (N, D))).astype(jnp.float32),
    }


# ---------------- pure-JAX reference (true conv semantics, f32) ---------------------
def reference_forward(pixel_values, params, cfg):
    P = cfg.patch_size
    D = cfg.hidden_size
    conv = lax.conv_general_dilated(
        pixel_values, params["conv_w"],
        window_strides=(P, P), padding="VALID",
        dimension_numbers=("NCHW", "OIHW", "NCHW"))     # (B, D, H/P, W/P)
    B = conv.shape[0]
    emb = conv.reshape(B, D, -1).transpose(0, 2, 1)     # flatten(2).transpose(1, 2)
    return emb + params["conv_b"].reshape(1, 1, D) + params["pos_emb"][None]


# ---------------- main ---------------------------------------------------------------
if __name__ == "__main__":
    cfg = Config()
    key = jax.random.PRNGKey(0)
    k_pix, k_par = jax.random.split(key)

    B = 2
    pixel_values = jax.random.normal(
        k_pix, (B, cfg.num_channels, cfg.image_size, cfg.image_size), jnp.float32)
    raw_params = init_params(cfg, k_par)
    prepared = jax.tree_util.tree_map(jax.block_until_ready,
                                      prepare_params(raw_params, cfg))  # one-time prep

    out = siglip_vision_embeddings(pixel_values, prepared, cfg)
    out = jax.block_until_ready(out)

    N = (cfg.image_size // cfg.patch_size) ** 2
    assert out.shape == (B, N, cfg.hidden_size)

    ref = reference_forward(pixel_values, raw_params, cfg)
    # f32 operands on both sides; tolerance only covers TPU default-precision
    # matmul/conv rounding differences.
    assert jnp.allclose(out, ref, rtol=2e-2, atol=2e-2), "mismatch vs JAX reference"

    print("KERNEL_OK")
</pallas_src>

<mosaic_0001>
module attributes {stable_mosaic.version = 11 : i64} {
  func.func @patch_embed_kernel(%arg0: i32, %arg1: memref<32x192xf32, #tpu.memory_space<vmem>>, %arg2: memref<192x128xf32, #tpu.memory_space<vmem>>, %arg3: memref<16x128xf32, #tpu.memory_space<vmem>>, %arg4: memref<32x128xf32, #tpu.memory_space<vmem>>) attributes {dimension_semantics = [#tpu.dimension_semantics<arbitrary>], iteration_bounds = array<i64: 1>, scalar_prefetch = 0 : i64, scratch_operands = 0 : i64, tpu.core_type = #tpu.core_type<tc>, window_params = [{pipeline_mode = #tpu.pipeline_mode<synchronous>, transform_indices = @transform_0, window_bounds = array<i64: 32, 192>}, {pipeline_mode = #tpu.pipeline_mode<synchronous>, transform_indices = @transform_1, window_bounds = array<i64: 192, 128>}, {pipeline_mode = #tpu.pipeline_mode<synchronous>, transform_indices = @transform_2, window_bounds = array<i64: 16, 128>}, {pipeline_mode = #tpu.pipeline_mode<synchronous>, transform_indices = @transform_3, window_bounds = array<i64: 32, 128>}]} {
    %c0 = arith.constant 0 : index
    %c0_0 = arith.constant 0 : index
    %0 = vector.load %arg1[%c0, %c0_0] : memref<32x192xf32, #tpu.memory_space<vmem>>, vector<32x192xf32>
    %c0_1 = arith.constant 0 : index
    %c0_2 = arith.constant 0 : index
    %1 = vector.load %arg2[%c0_1, %c0_2] : memref<192x128xf32, #tpu.memory_space<vmem>>, vector<192x128xf32>
    %cst = arith.constant dense<0.000000e+00> : vector<32x128xf32>
    %2 = tpu.matmul %0, %1, %cst {dimension_numbers = #tpu.dot_dimension_numbers<[1], [0], [0], [1], [0, 0, 1, 1], [], []>} : vector<32x192xf32>, vector<192x128xf32>, vector<32x128xf32> -> vector<32x128xf32>
    %c0_3 = arith.constant 0 : index
    %c0_4 = arith.constant 0 : index
    %3 = vector.load %arg3[%c0_3, %c0_4] : memref<16x128xf32, #tpu.memory_space<vmem>>, vector<16x128xf32>
    %4 = tpu.concatenate %3, %3 in 0 : vector<16x128xf32>, vector<16x128xf32> -> vector<32x128xf32>
    %5 = arith.addf %2, %4 : vector<32x128xf32>
    %c0_5 = arith.constant 0 : index
    %c0_6 = arith.constant 0 : index
    %6 = vector.load %arg4[%c0_5, %c0_6] : memref<32x128xf32, #tpu.memory_space<vmem>>, vector<32x128xf32>
    tpu.vector_store %arg4[%c0_5, %c0_6], %5 {strides = array<i32>} : memref<32x128xf32, #tpu.memory_space<vmem>>, vector<32x128xf32>,
    return
  }
  func.func @transform_0(%arg0: i32) -> (i32, i32) {
    %c0_i32 = arith.constant 0 : i32
    %c0_i32_0 = arith.constant 0 : i32
    %c0_i32_1 = arith.constant 0 : i32
    return %c0_i32, %c0_i32_0 : i32, i32
  }
  func.func @transform_1(%arg0: i32) -> (i32, i32) {
    %c0_i32 = arith.constant 0 : i32
    %c0_i32_0 = arith.constant 0 : i32
    %c0_i32_1 = arith.constant 0 : i32
    return %c0_i32, %c0_i32_0 : i32, i32
  }
  func.func @transform_2(%arg0: i32) -> (i32, i32) {
    %c0_i32 = arith.constant 0 : i32
    %c0_i32_0 = arith.constant 0 : i32
    %c0_i32_1 = arith.constant 0 : i32
    return %c0_i32, %c0_i32_0 : i32, i32
  }
  func.func @transform_3(%arg0: i32) -> (i32, i32) {
    %c0_i32 = arith.constant 0 : i32
    %c0_i32_0 = arith.constant 0 : i32
    %c0_i32_1 = arith.constant 0 : i32
    return %c0_i32, %c0_i32_0 : i32, i32
  }
}

</mosaic_0001>

<bundles_post_ra>
// kernel: siglip_vision_embeddings.1
= control target key start
LH: loop header
LB: loop body
LE: loop exit
PB: predicated region body
PF: predicated region fallthrough
CT: control target
= control target key end

     0   :  { %s339_s0 = inlined_call_operand.vmem [shape: f32[32,192], index: 0, kind: input, shape index: {}]   ;;  %s340_s1 = inlined_call_operand.vmem [shape: f32[192,128], index: 1, kind: input, shape index: {}]   ;;  %s341_s2 = inlined_call_operand.vmem [shape: f32[16,128], index: 2, kind: input, shape index: {}]   ;;  %s342_s3 = inlined_call_operand.hbm [shape: f32[32,128], index: 3, kind: output, shape index: {}]  }
   0x1   :  { %v38_v0 = vld [vmem:[%s340_s1 + $0x78] sm:$0xff]  ;;  %v37_v1 = vld [vmem:[%s340_s1 + $0x70] sm:$0xff]  ;;  %v36_v3 = vld [vmem:[%s340_s1 + $0x68] sm:$0xff] }
   0x2   :  { %62 = vmatpush.msra.mxu0 %v38_v0  ;;  %146 = vmatpush.msra.mxu2 %v38_v0  ;;  %v46_v2 = vld [vmem:[%s340_s1 + $0xb8] sm:$0xff]  ;;  %v45_v4 = vld [vmem:[%s340_s1 + $0xb0] sm:$0xff]  ;;  %v44_v5 = vld [vmem:[%s340_s1 + $0xa8] sm:$0xff] }
   0x3   :  { %147 = vmatpush.msra.mxu3 %v38_v0  ;;  %99 = vmatpush.msra.mxu1 %v46_v2  ;;  %v35_v6 = vld [vmem:[%s340_s1 + $0x60] sm:$0xff]  ;;  %v34_v8 = vld [vmem:[%s340_s1 + $0x58] sm:$0xff]  ;;  %v33_v10 = vld [vmem:[%s340_s1 + $0x50] sm:$0xff] }
   0x4   :  { %63 = vmatpush.msra.mxu0 %v37_v1  ;;  %148 = vmatpush.msra.mxu2 %v37_v1  ;;  %v43_v7 = vld [vmem:[%s340_s1 + $0xa0] sm:$0xff]  ;;  %v42_v9 = vld [vmem:[%s340_s1 + $0x98] sm:$0xff]  ;;  %v41_v11 = vld [vmem:[%s340_s1 + $0x90] sm:$0xff] }
   0x5   :  { %149 = vmatpush.msra.mxu3 %v37_v1  ;;  %100 = vmatpush.msra.mxu1 %v45_v4  ;;  %v32_v12 = vld [vmem:[%s340_s1 + $0x48] sm:$0xff] }
   0x6   :  { %64 = vmatpush.msra.mxu0 %v36_v3  ;;  %150 = vmatpush.msra.mxu2 %v36_v3 }
   0x7   :  { %151 = vmatpush.msra.mxu3 %v36_v3  ;;  %101 = vmatpush.msra.mxu1 %v44_v5 }
   0x8   :  { %65 = vmatpush.msra.mxu0 %v35_v6  ;;  %152 = vmatpush.msra.mxu2 %v35_v6 }
   0x9   :  { %153 = vmatpush.msra.mxu3 %v35_v6  ;;  %102 = vmatpush.msra.mxu1 %v43_v7 }
   0xa   :  { %66 = vmatpush.msra.mxu0 %v34_v8  ;;  %154 = vmatpush.msra.mxu2 %v34_v8 }
   0xb   :  { %155 = vmatpush.msra.mxu3 %v34_v8  ;;  %103 = vmatpush.msra.mxu1 %v42_v9 }
   0xc   :  { %8 = vsyncpa [#allocation3], 0  ;;  %67 = vmatpush.msra.mxu0 %v33_v10  ;;  %156 = vmatpush.msra.mxu2 %v33_v10  ;;  %v40_v13 = vld [vmem:[%s340_s1 + $0x88] sm:$0xff]  ;;  %v31_v14 = vld [vmem:[%s340_s1 + $0x40] sm:$0xff]  ;;  %vm49_vm0 = vcmask 523264   ;;  %s130_s28 = sshll.u32 %s342_s3, 4  ;;  %s131_s28 = int_to_ptr.hbm [resolvable:$true] %s130_s28 }
   0xd   :  { %157 = vmatpush.msra.mxu3 %v33_v10  ;;  %104 = vmatpush.msra.mxu1 %v41_v11  ;;  %v39_v15 = vld [vmem:[%s340_s1 + $0x80] sm:$0xff]  ;;  %v30_v16 = vld [vmem:[%s340_s1 + $0x38] sm:$0xff]  ;;  %v16_v17 = vld [vmem:[%s339_s0 + $0x8] sm:$0xff]  ;;  %s209_s29 = smov 8  }
   0xe   :  { %68 = vmatpush.msra.mxu0 %v32_v12  ;;  %158 = vmatpush.msra.mxu2 %v32_v12  ;;  %v29_v18 = vld [vmem:[%s340_s1 + $0x30] sm:$0xff]  ;;  %v28_v19 = vld [vmem:[%s340_s1 + $0x28] sm:$0xff]  ;;  %v27_v20 = vld [vmem:[%s340_s1 + $0x20] sm:$0xff] }
   0xf   :  { %159 = vmatpush.msra.mxu3 %v32_v12  ;;  %105 = vmatpush.msra.mxu1 %v40_v13  ;;  %v26_v21 = vld [vmem:[%s340_s1 + $0x18] sm:$0xff]  ;;  %v25_v23 = vld [vmem:[%s340_s1 + $0x10] sm:$0xff]  ;;  %v24_v24 = vld [vmem:[%s340_s1 + $0x8] sm:$0xff] }
  0x10   :  { %69 = vmatpush.msra.mxu0 %v31_v14  ;;  %160 = vmatpush.msra.mxu2 %v31_v14  ;;  %v18_v22 = vld [vmem:[%s339_s0 + $0x18] sm:$0xff]  ;;  %v23_v25 = vld [vmem:[%s340_s1] sm:$0xff]  ;;  %v17_v27 = vld [vmem:[%s339_s0 + $0x10] sm:$0xff] }
  0x11   :  { %161 = vmatpush.msra.mxu3 %v31_v14  ;;  %106 = vmatpush.msra.mxu1 %v39_v15  ;;  %v15_v26 = vld [vmem:[%s339_s0] sm:$0xff]  ;;  %v20_v29 = vld [vmem:[%s339_s0 + $0x28] sm:$0xff]  ;;  %v21_v30 = vld [vmem:[%s339_s0 + $0x30] sm:$0xff] }
  0x12   :  { %70 = vmatpush.msra.mxu0 %v30_v16  ;;  %162 = vmatpush.msra.mxu2 %v30_v16  ;;  %v19_v28 = vld [vmem:[%s339_s0 + $0x20] sm:$0xff]  ;;  %v22_v31 = vld [vmem:[%s339_s0 + $0x38] sm:$0xff]  ;;  %v48_v38 = vld [vmem:[%s341_s2 + $0x8] sm:$0xff]  ;;  %s207_s0 = smov [#allocation2]  }
  0x13   :  { %163 = vmatpush.msra.mxu3 %v30_v16  ;;  %142 = vmatmul.msk.f32.vlgmr.msra.gmra.mxu1 %vm49_vm0, %v16_v17  ;;  %v47_v34 = vld [vmem:[%s341_s2] sm:$0xff]  ;;  %s128_s25 = sshll.u32 %s207_s0, 4  ;;  %s208_s2 = smov 128   ;;  %s129_s25 = int_to_ptr.vmem [resolvable:$true] %s128_s25 }
  0x14   :  { %71 = vmatpush.msra.mxu0 %v29_v18  ;;  %164 = vmatpush.msra.mxu2 %v29_v18 }
  0x15   :  { %165 = vmatpush.msra.mxu3 %v29_v18 }
  0x16   :  { %72 = vmatpush.msra.mxu0 %v28_v19  ;;  %166 = vmatpush.msra.mxu2 %v28_v19 }
  0x17   :  { %167 = vmatpush.msra.mxu3 %v28_v19 }
  0x18   :  { %73 = vmatpush.msra.mxu0 %v27_v20  ;;  %168 = vmatpush.msra.mxu2 %v27_v20 }
  0x19   :  { %169 = vmatpush.msra.mxu3 %v27_v20 }
  0x1a   :  { %74 = vmatpush.msra.mxu0 %v26_v21  ;;  %170 = vmatpush.msra.mxu2 %v26_v21 }
  0x1b   :  { %171 = vmatpush.msra.mxu3 %v26_v21  ;;  %143 = vmatmul.msk.f32.gmra.mxu1 %vm49_vm0, %v18_v22 }
  0x1c   :  { %75 = vmatpush.msra.mxu0 %v25_v23  ;;  %172 = vmatpush.msra.mxu2 %v25_v23 }
  0x1d   :  { %173 = vmatpush.msra.mxu3 %v25_v23 }
  0x1e   :  { %76 = vmatpush.msra.mxu0 %v24_v24  ;;  %174 = vmatpush.msra.mxu2 %v24_v24 }
  0x1f   :  { %175 = vmatpush.msra.mxu3 %v24_v24 }
  0x20   :  { %77 = vmatpush.msra.mxu0 %v23_v25  ;;  %176 = vmatpush.msra.mxu2 %v23_v25 }
  0x21   :  { %177 = vmatpush.msra.mxu3 %v23_v25  ;;  %78 = vmatmul.f32.vlgmr.msra.gmra.mxu0 %v15_v26 }
  0x22   :  { %81 = vmatmul.f32.vlgmr.msra.gmra.mxu2 %v17_v27  ;;  %84 = vmatmul.f32.vlgmr.msra.gmra.mxu3 %v19_v28 }
  0x23   :  { %144 = vmatmul.msk.f32.gmra.mxu1 %vm49_vm0, %v20_v29 }
  0x2a   :  { %87 = vmatmul.f32.gmra.mxu3 %v21_v30 }
  0x2b   :  { %145 = vmatmul.msk.f32.gmra.mxu1 %vm49_vm0, %v22_v31 }
  0x90   :  { %v108_v32 = vpop.f32.mrf.mxu1 }
  0x98   :  { %v111_v33 = vpop.f32.mrf.mxu1 }
  0x9e   :  { %v79_v35 = vpop.f32.mrf.mxu0 }
  0x9f   :  { %v80_v36 = vadd.f32 %v79_v35, %v47_v34 }
  0xa0   :  { %v114_v39 = vpop.f32.mrf.mxu1 }
  0xa1   :  { %v109_v37 = vadd.f32 %v108_v32, %v80_v36 }
  0xa3   :  { %120 = vst [vmem:[#allocation2] sm:$0xff] %v109_v37 }
  0xa5   :  { %v82_v40 = vpop.f32.mrf.mxu2  ;;  %v85_v41 = vpop.f32.mrf.mxu3 }
  0xa6   :  { %v83_v42 = vadd.f32 %v82_v40, %v48_v38  ;;  %v86_v43 = vadd.f32 %v85_v41, %v47_v34 }
  0xa8   :  { %v112_v44 = vadd.f32 %v111_v33, %v83_v42  ;;  %v115_v45 = vadd.f32 %v114_v39, %v86_v43  ;;  %v117_v47 = vpop.f32.mrf.mxu1 }
  0xaa   :  { %121 = vst [vmem:[#allocation2 + $0x8] sm:$0xff] %v112_v44 }
  0xab   :  { %122 = vst [vmem:[#allocation2 + $0x10] sm:$0xff] %v115_v45 }
  0xad   :  { %v88_v46 = vpop.f32.mrf.mxu3 }
  0xae   :  { %v89_v48 = vadd.f32 %v88_v46, %v48_v38 }
  0xb0   :  { %v118_v49 = vadd.f32 %v117_v47, %v89_v48 }
  0xb2   :  { %123 = vst [vmem:[#allocation2 + $0x18] sm:$0xff] %v118_v49 }
  0xb3   :  { %136 = dma.vmem_to_hbm [thread:$0]  %s129_s25, 512, %s131_s28, [#allocation3], %s208_s2, %s208_s2, %s209_s29  }
  0xb4   :  { %205 = dma.done.wait [#allocation3], 512  }
  0xb5   :  { %206 = vsyncadd [#allocation3], 4294966784 }
  0xb6   :  { %141 = vsyncpa [#allocation3], 1 }

</bundles_post_ra>
